<compile_context>
chip_gen: v7x
topology: tpu7x:2x2x1
jax: 0.10.0
libtpu: 0.0.40
codegen_flags: <defaults>
</compile_context>

<pallas_src>
import functools

import numpy as np
import jax
import jax.numpy as jnp
from jax import lax
from jax.experimental import pallas as pl
from jax.experimental.pallas import tpu as pltpu


_SQRT_2_OVER_PI = 0.7978845608028654


def _gelu_tanh(x):
    # TODO(synk): PyTorch F.gelu defaults to erf-exact; the tanh-approximate GELU
    # (max abs deviation ~3e-4) is used since exact erf lowering is not guaranteed.
    return 0.5 * x * (1.0 + jnp.tanh(_SQRT_2_OVER_PI * (x + 0.044715 * x * x * x)))


def _layernorm(h, gamma, beta, eps):
    mu = jnp.mean(h, axis=-1, keepdims=True)
    var = jnp.mean(jnp.square(h - mu), axis=-1, keepdims=True)
    return (h - mu) * lax.rsqrt(var + eps) * gamma + beta


def _linearcls_kernel(x_ref, w1_ref, b1_ref, g1_ref, be1_ref,
                      w2_ref, b2_ref, g2_ref, be2_ref,
                      w3_ref, b3_ref, o_ref, *, ln_eps):
    # bf16 MXU matmuls with f32 accumulation; LN/GELU elementwise kept in f32
    # (correct on all generations, including v5e which lacks bf16 VPU/EUP).
    h = jnp.dot(x_ref[...], w1_ref[...],
                preferred_element_type=jnp.float32) + b1_ref[...]
    h = _gelu_tanh(_layernorm(h, g1_ref[...], be1_ref[...], ln_eps))

    h = jnp.dot(h.astype(jnp.bfloat16), w2_ref[...],
                preferred_element_type=jnp.float32) + b2_ref[...]
    h = _gelu_tanh(_layernorm(h, g2_ref[...], be2_ref[...], ln_eps))

    o_ref[...] = (jnp.dot(h.astype(jnp.bfloat16), w3_ref[...],
                          preferred_element_type=jnp.float32)
                  + b3_ref[...]).astype(o_ref.dtype)


def _round_up(v, m):
    return ((v + m - 1) // m) * m


def _pick_batch_tile(b):
    """Batch tile: multiple of 8 sublanes, <=512 rows, >=2 grid steps when B>8."""
    b8 = _round_up(max(int(b), 1), 8)
    if b8 <= 8:
        return b8
    half = _round_up((b8 + 1) // 2, 8)   # at most half the batch -> >=2 steps (v7x)
    return min(512, half)                # 512-row tiles ~= measured HBM sweet spot


def linearcls_forward(x, params, *, ln_eps=1e-5):
    """Pallas forward of Linearcls (take_embed='first'; p0/dropout are identity)."""
    w1, b1, g1, be1, w2, b2, g2, be2, w3, b3 = params
    B, S, D = x.shape
    H1, H2, O = int(w1.shape[1]), int(w2.shape[1]), int(w3.shape[1])

    # take_embed='first' + bf16 cast (+ pad only when needed): a single fused XLA
    # copy producing the kernel's only streamed input.
    x2 = jnp.asarray(x)[:, 0, :].astype(jnp.bfloat16)
    TB = _pick_batch_tile(B)
    B_pad = _round_up(B, TB)
    if B_pad != B:
        x2 = jnp.pad(x2, ((0, B_pad - B), (0, 0)))

    # Lane-dense output: pad the final projection to a multiple of 128 lanes so
    # the (TB, O_pad) output block stores with unmasked vst; sliced off below.
    O_pad = _round_up(O, 128)
    w3p = jnp.zeros((H2, O_pad), jnp.float32).at[:, :O].set(
        jnp.asarray(w3, jnp.float32))
    b3p = jnp.zeros((O_pad,), jnp.float32).at[:O].set(jnp.asarray(b3, jnp.float32))

    bf16 = lambda v: jnp.asarray(v, jnp.bfloat16)
    f32row = lambda v: jnp.asarray(v, jnp.float32).reshape(1, -1)
    # Grid-invariant params (constant index_map) stay VMEM-resident across steps.
    # TODO(synk): pipeline_mode=pl.Buffered(1) would single-buffer these resident
    # weights; negligible VMEM saving at these sizes, so left at the default.
    const = lambda shape: pl.BlockSpec(shape, lambda i: (0, 0))

    out = pl.pallas_call(
        functools.partial(_linearcls_kernel, ln_eps=float(ln_eps)),
        out_shape=jax.ShapeDtypeStruct((B_pad, O_pad), jnp.float32),
        grid=(B_pad // TB,),
        in_specs=[
            pl.BlockSpec((TB, D), lambda i: (i, 0)),                 # streamed x tile
            const((D, H1)), const((1, H1)), const((1, H1)), const((1, H1)),
            const((H1, H2)), const((1, H2)), const((1, H2)), const((1, H2)),
            const((H2, O_pad)), const((1, O_pad)),
        ],
        out_specs=pl.BlockSpec((TB, O_pad), lambda i: (i, 0)),
        compiler_params=pltpu.CompilerParams(
            dimension_semantics=("parallel",),
            vmem_limit_bytes=48 * 1024 * 1024,
        ),
    )(x2,
      bf16(w1), f32row(b1), f32row(g1), f32row(be1),
      bf16(w2), f32row(b2), f32row(g2), f32row(be2),
      bf16(w3p), f32row(b3p))
    return out[:B, :O]


def _reference(x, params, ln_eps=1e-5):
    """Pure-JAX f32 reference of the same forward pass (PyTorch semantics)."""
    w1, b1, g1, be1, w2, b2, g2, be2, w3, b3 = [
        jnp.asarray(p, jnp.float32) for p in params
    ]

    def ln(h, g, b):
        mu = h.mean(-1, keepdims=True)
        var = ((h - mu) ** 2).mean(-1, keepdims=True)
        return (h - mu) / jnp.sqrt(var + ln_eps) * g + b

    def gelu(h):
        return 0.5 * h * (1.0 + jnp.tanh(_SQRT_2_OVER_PI * (h + 0.044715 * h ** 3)))

    h = jnp.asarray(x, jnp.float32)[:, 0, :]
    h = gelu(ln(h @ w1 + b1, g1, be1))
    h = gelu(ln(h @ w2 + b2, g2, be2))
    return h @ w3 + b3


def _make_params(key, D, H1, H2, O):
    ks = jax.random.split(key, 10)
    w1 = jax.random.normal(ks[0], (D, H1), jnp.float32) / np.sqrt(D)
    b1 = 0.01 * jax.random.normal(ks[1], (H1,), jnp.float32)
    g1 = 1.0 + 0.1 * jax.random.normal(ks[2], (H1,), jnp.float32)
    be1 = 0.1 * jax.random.normal(ks[3], (H1,), jnp.float32)
    w2 = jax.random.normal(ks[4], (H1, H2), jnp.float32) / np.sqrt(H1)
    b2 = 0.01 * jax.random.normal(ks[5], (H2,), jnp.float32)
    g2 = 1.0 + 0.1 * jax.random.normal(ks[6], (H2,), jnp.float32)
    be2 = 0.1 * jax.random.normal(ks[7], (H2,), jnp.float32)
    w3 = jax.random.normal(ks[8], (H2, O), jnp.float32) / np.sqrt(H2)
    b3 = 0.01 * jax.random.normal(ks[9], (O,), jnp.float32)
    return (w1, b1, g1, be1, w2, b2, g2, be2, w3, b3)


if __name__ == "__main__":
    key = jax.random.PRNGKey(0)
    # Shapes consistent with the module: input_dim=512 -> hidden 256/128, output_dim=1.
    D, O = 512, 1
    H1, H2 = D // 2, D // 4

    kp, kx1, kx2 = jax.random.split(key, 3)
    params = _make_params(kp, D, H1, H2, O)

    # Case 1: small batch (single grid step).
    x_small = jax.random.normal(kx1, (8, 4, D), dtype=jnp.float32)
    out_small = jax.block_until_ready(linearcls_forward(x_small, params))
    ref_small = _reference(x_small, params)
    # bf16 matmul path vs f32 reference -> loosen tolerance accordingly.
    np.testing.assert_allclose(np.asarray(out_small), np.asarray(ref_small),
                               rtol=5e-2, atol=5e-2)

    # Case 2: batch that exercises the multi-step grid + padded last tile.
    x_big = jax.random.normal(kx2, (260, 4, D), dtype=jnp.float32)
    out_big = jax.block_until_ready(linearcls_forward(x_big, params))
    ref_big = _reference(x_big, params)
    np.testing.assert_allclose(np.asarray(out_big), np.asarray(ref_big),
                               rtol=5e-2, atol=5e-2)

    print("KERNEL_OK")
</pallas_src>

<mosaic_0001>
module attributes {stable_mosaic.version = 11 : i64} {
  func.func @_linearcls_kernel(%arg0: i32, %arg1: memref<8x512xbf16, #tpu.memory_space<vmem>>, %arg2: memref<512x256xbf16, #tpu.memory_space<vmem>>, %arg3: memref<1x256xf32, #tpu.memory_space<vmem>>, %arg4: memref<1x256xf32, #tpu.memory_space<vmem>>, %arg5: memref<1x256xf32, #tpu.memory_space<vmem>>, %arg6: memref<256x128xbf16, #tpu.memory_space<vmem>>, %arg7: memref<1x128xf32, #tpu.memory_space<vmem>>, %arg8: memref<1x128xf32, #tpu.memory_space<vmem>>, %arg9: memref<1x128xf32, #tpu.memory_space<vmem>>, %arg10: memref<128x128xbf16, #tpu.memory_space<vmem>>, %arg11: memref<1x128xf32, #tpu.memory_space<vmem>>, %arg12: memref<8x128xf32, #tpu.memory_space<vmem>>) attributes {dimension_semantics = [#tpu.dimension_semantics<parallel>], iteration_bounds = array<i64: 1>, scalar_prefetch = 0 : i64, scratch_operands = 0 : i64, tpu.core_type = #tpu.core_type<tc>, window_params = [{transform_indices = @transform_0, window_bounds = array<i64: 8, 512>}, {pipeline_mode = #tpu.pipeline_mode<synchronous>, transform_indices = @transform_1, window_bounds = array<i64: 512, 256>}, {pipeline_mode = #tpu.pipeline_mode<synchronous>, transform_indices = @transform_2, window_bounds = array<i64: 1, 256>}, {pipeline_mode = #tpu.pipeline_mode<synchronous>, transform_indices = @transform_3, window_bounds = array<i64: 1, 256>}, {pipeline_mode = #tpu.pipeline_mode<synchronous>, transform_indices = @transform_4, window_bounds = array<i64: 1, 256>}, {pipeline_mode = #tpu.pipeline_mode<synchronous>, transform_indices = @transform_5, window_bounds = array<i64: 256, 128>}, {pipeline_mode = #tpu.pipeline_mode<synchronous>, transform_indices = @transform_6, window_bounds = array<i64: 1, 128>}, {pipeline_mode = #tpu.pipeline_mode<synchronous>, transform_indices = @transform_7, window_bounds = array<i64: 1, 128>}, {pipeline_mode = #tpu.pipeline_mode<synchronous>, transform_indices = @transform_8, window_bounds = array<i64: 1, 128>}, {pipeline_mode = #tpu.pipeline_mode<synchronous>, transform_indices = @transform_9, window_bounds = array<i64: 128, 128>}, {pipeline_mode = #tpu.pipeline_mode<synchronous>, transform_indices = @transform_10, window_bounds = array<i64: 1, 128>}, {transform_indices = @transform_11, window_bounds = array<i64: 8, 128>}]} {
    %c0 = arith.constant 0 : index
    %c0_0 = arith.constant 0 : index
    %0 = vector.load %arg1[%c0, %c0_0] : memref<8x512xbf16, #tpu.memory_space<vmem>>, vector<8x512xbf16>
    %c0_1 = arith.constant 0 : index
    %c0_2 = arith.constant 0 : index
    %1 = vector.load %arg2[%c0_1, %c0_2] : memref<512x256xbf16, #tpu.memory_space<vmem>>, vector<512x256xbf16>
    %cst = arith.constant dense<0.000000e+00> : vector<8x256xf32>
    %2 = tpu.matmul %0, %1, %cst {dimension_numbers = #tpu.dot_dimension_numbers<[1], [0], [0], [1], [0, 0, 1, 1], [], []>} : vector<8x512xbf16>, vector<512x256xbf16>, vector<8x256xf32> -> vector<8x256xf32>
    %c0_3 = arith.constant 0 : index
    %c0_4 = arith.constant 0 : index
    %3 = vector.load %arg3[%c0_3, %c0_4] : memref<1x256xf32, #tpu.memory_space<vmem>>, vector<1x256xf32>
    %4 = vector.broadcast %3 : vector<1x256xf32> to vector<8x256xf32>
    %5 = arith.addf %2, %4 : vector<8x256xf32>
    %c0_5 = arith.constant 0 : index
    %c0_6 = arith.constant 0 : index
    %6 = vector.load %arg4[%c0_5, %c0_6] : memref<1x256xf32, #tpu.memory_space<vmem>>, vector<1x256xf32>
    %c0_7 = arith.constant 0 : index
    %c0_8 = arith.constant 0 : index
    %7 = vector.load %arg5[%c0_7, %c0_8] : memref<1x256xf32, #tpu.memory_space<vmem>>, vector<1x256xf32>
    %cst_9 = arith.constant dense<0.000000e+00> : vector<8xf32>
    %8 = vector.multi_reduction <add>, %5, %cst_9 [1] : vector<8x256xf32> to vector<8xf32>
    %9 = vector.shape_cast %8 : vector<8xf32> to vector<8x1xf32>
    %cst_10 = arith.constant 2.560000e+02 : f32
    %10 = vector.broadcast %cst_10 : f32 to vector<8x1xf32>
    %11 = arith.divf %9, %10 : vector<8x1xf32>
    %12 = vector.broadcast %11 : vector<8x1xf32> to vector<8x256xf32>
    %13 = arith.subf %5, %12 : vector<8x256xf32>
    %14 = arith.mulf %13, %13 : vector<8x256xf32>
    %cst_11 = arith.constant dense<0.000000e+00> : vector<8xf32>
    %15 = vector.multi_reduction <add>, %14, %cst_11 [1] : vector<8x256xf32> to vector<8xf32>
    %16 = vector.shape_cast %15 : vector<8xf32> to vector<8x1xf32>
    %cst_12 = arith.constant 2.560000e+02 : f32
    %17 = vector.broadcast %cst_12 : f32 to vector<8x1xf32>
    %18 = arith.divf %16, %17 : vector<8x1xf32>
    %19 = vector.broadcast %11 : vector<8x1xf32> to vector<8x256xf32>
    %20 = arith.subf %5, %19 : vector<8x256xf32>
    %cst_13 = arith.constant 9.99999974E-6 : f32
    %21 = vector.broadcast %cst_13 : f32 to vector<8x1xf32>
    %22 = arith.addf %18, %21 : vector<8x1xf32>
    %23 = math.rsqrt %22 : vector<8x1xf32>
    %24 = vector.broadcast %23 : vector<8x1xf32> to vector<8x256xf32>
    %25 = arith.mulf %20, %24 : vector<8x256xf32>
    %26 = vector.broadcast %6 : vector<1x256xf32> to vector<8x256xf32>
    %27 = arith.mulf %25, %26 : vector<8x256xf32>
    %28 = vector.broadcast %7 : vector<1x256xf32> to vector<8x256xf32>
    %29 = arith.addf %27, %28 : vector<8x256xf32>
    %cst_14 = arith.constant 5.000000e-01 : f32
    %30 = vector.broadcast %cst_14 : f32 to vector<8x256xf32>
    %31 = arith.mulf %30, %29 : vector<8x256xf32>
    %cst_15 = arith.constant 4.471500e-02 : f32
    %32 = vector.broadcast %cst_15 : f32 to vector<8x256xf32>
    %33 = arith.mulf %32, %29 : vector<8x256xf32>
    %34 = arith.mulf %33, %29 : vector<8x256xf32>
    %35 = arith.mulf %34, %29 : vector<8x256xf32>
    %36 = arith.addf %29, %35 : vector<8x256xf32>
    %cst_16 = arith.constant 0.797884583 : f32
    %37 = vector.broadcast %cst_16 : f32 to vector<8x256xf32>
    %38 = arith.mulf %37, %36 : vector<8x256xf32>
    %39 = math.tanh %38 : vector<8x256xf32>
    %cst_17 = arith.constant 1.000000e+00 : f32
    %40 = vector.broadcast %cst_17 : f32 to vector<8x256xf32>
    %41 = arith.addf %40, %39 : vector<8x256xf32>
    %42 = arith.mulf %31, %41 : vector<8x256xf32>
    %43 = arith.truncf %42 : vector<8x256xf32> to vector<8x256xbf16>
    %c0_18 = arith.constant 0 : index
    %c0_19 = arith.constant 0 : index
    %44 = vector.load %arg6[%c0_18, %c0_19] : memref<256x128xbf16, #tpu.memory_space<vmem>>, vector<256x128xbf16>
    %cst_20 = arith.constant dense<0.000000e+00> : vector<8x128xf32>
    %45 = tpu.matmul %43, %44, %cst_20 {dimension_numbers = #tpu.dot_dimension_numbers<[1], [0], [0], [1], [0, 0, 1, 1], [], []>} : vector<8x256xbf16>, vector<256x128xbf16>, vector<8x128xf32> -> vector<8x128xf32>
    %c0_21 = arith.constant 0 : index
    %c0_22 = arith.constant 0 : index
    %46 = vector.load %arg7[%c0_21, %c0_22] : memref<1x128xf32, #tpu.memory_space<vmem>>, vector<1x128xf32>
    %47 = vector.broadcast %46 : vector<1x128xf32> to vector<8x128xf32>
    %48 = arith.addf %45, %47 : vector<8x128xf32>
    %c0_23 = arith.constant 0 : index
    %c0_24 = arith.constant 0 : index
    %49 = vector.load %arg8[%c0_23, %c0_24] : memref<1x128xf32, #tpu.memory_space<vmem>>, vector<1x128xf32>
    %c0_25 = arith.constant 0 : index
    %c0_26 = arith.constant 0 : index
    %50 = vector.load %arg9[%c0_25, %c0_26] : memref<1x128xf32, #tpu.memory_space<vmem>>, vector<1x128xf32>
    %cst_27 = arith.constant dense<0.000000e+00> : vector<8xf32>
    %51 = vector.multi_reduction <add>, %48, %cst_27 [1] : vector<8x128xf32> to vector<8xf32>
    %52 = vector.shape_cast %51 : vector<8xf32> to vector<8x1xf32>
    %cst_28 = arith.constant 1.280000e+02 : f32
    %53 = vector.broadcast %cst_28 : f32 to vector<8x1xf32>
    %54 = arith.divf %52, %53 : vector<8x1xf32>
    %55 = vector.broadcast %54 : vector<8x1xf32> to vector<8x128xf32>
    %56 = arith.subf %48, %55 : vector<8x128xf32>
    %57 = arith.mulf %56, %56 : vector<8x128xf32>
    %cst_29 = arith.constant dense<0.000000e+00> : vector<8xf32>
    %58 = vector.multi_reduction <add>, %57, %cst_29 [1] : vector<8x128xf32> to vector<8xf32>
    %59 = vector.shape_cast %58 : vector<8xf32> to vector<8x1xf32>
    %cst_30 = arith.constant 1.280000e+02 : f32
    %60 = vector.broadcast %cst_30 : f32 to vector<8x1xf32>
    %61 = arith.divf %59, %60 : vector<8x1xf32>
    %62 = vector.broadcast %54 : vector<8x1xf32> to vector<8x128xf32>
    %63 = arith.subf %48, %62 : vector<8x128xf32>
    %cst_31 = arith.constant 9.99999974E-6 : f32
    %64 = vector.broadcast %cst_31 : f32 to vector<8x1xf32>
    %65 = arith.addf %61, %64 : vector<8x1xf32>
    %66 = math.rsqrt %65 : vector<8x1xf32>
    %67 = vector.broadcast %66 : vector<8x1xf32> to vector<8x128xf32>
    %68 = arith.mulf %63, %67 : vector<8x128xf32>
    %69 = vector.broadcast %49 : vector<1x128xf32> to vector<8x128xf32>
    %70 = arith.mulf %68, %69 : vector<8x128xf32>
    %71 = vector.broadcast %50 : vector<1x128xf32> to vector<8x128xf32>
    %72 = arith.addf %70, %71 : vector<8x128xf32>
    %cst_32 = arith.constant 5.000000e-01 : f32
    %73 = vector.broadcast %cst_32 : f32 to vector<8x128xf32>
    %74 = arith.mulf %73, %72 : vector<8x128xf32>
    %cst_33 = arith.constant 4.471500e-02 : f32
    %75 = vector.broadcast %cst_33 : f32 to vector<8x128xf32>
    %76 = arith.mulf %75, %72 : vector<8x128xf32>
    %77 = arith.mulf %76, %72 : vector<8x128xf32>
    %78 = arith.mulf %77, %72 : vector<8x128xf32>
    %79 = arith.addf %72, %78 : vector<8x128xf32>
    %cst_34 = arith.constant 0.797884583 : f32
    %80 = vector.broadcast %cst_34 : f32 to vector<8x128xf32>
    %81 = arith.mulf %80, %79 : vector<8x128xf32>
    %82 = math.tanh %81 : vector<8x128xf32>
    %cst_35 = arith.constant 1.000000e+00 : f32
    %83 = vector.broadcast %cst_35 : f32 to vector<8x128xf32>
    %84 = arith.addf %83, %82 : vector<8x128xf32>
    %85 = arith.mulf %74, %84 : vector<8x128xf32>
    %86 = arith.truncf %85 : vector<8x128xf32> to vector<8x128xbf16>
    %c0_36 = arith.constant 0 : index
    %c0_37 = arith.constant 0 : index
    %87 = vector.load %arg10[%c0_36, %c0_37] : memref<128x128xbf16, #tpu.memory_space<vmem>>, vector<128x128xbf16>
    %cst_38 = arith.constant dense<0.000000e+00> : vector<8x128xf32>
    %88 = tpu.matmul %86, %87, %cst_38 {dimension_numbers = #tpu.dot_dimension_numbers<[1], [0], [0], [1], [0, 0, 1, 1], [], []>} : vector<8x128xbf16>, vector<128x128xbf16>, vector<8x128xf32> -> vector<8x128xf32>
    %c0_39 = arith.constant 0 : index
    %c0_40 = arith.constant 0 : index
    %89 = vector.load %arg11[%c0_39, %c0_40] : memref<1x128xf32, #tpu.memory_space<vmem>>, vector<1x128xf32>
    %90 = vector.broadcast %89 : vector<1x128xf32> to vector<8x128xf32>
    %91 = arith.addf %88, %90 : vector<8x128xf32>
    %c0_41 = arith.constant 0 : index
    %c0_42 = arith.constant 0 : index
    %92 = vector.load %arg12[%c0_41, %c0_42] : memref<8x128xf32, #tpu.memory_space<vmem>>, vector<8x128xf32>
    tpu.vector_store %arg12[%c0_41, %c0_42], %91 {strides = array<i32>} : memref<8x128xf32, #tpu.memory_space<vmem>>, vector<8x128xf32>,
    return
  }
  func.func @transform_0(%arg0: i32) -> (i32, i32) {
    %c0_i32 = arith.constant 0 : i32
    %c0_i32_0 = arith.constant 0 : i32
    return %arg0, %c0_i32 : i32, i32
  }
  func.func @transform_1(%arg0: i32) -> (i32, i32) {
    %c0_i32 = arith.constant 0 : i32
    %c0_i32_0 = arith.constant 0 : i32
    %c0_i32_1 = arith.constant 0 : i32
    return %c0_i32, %c0_i32_0 : i32, i32
  }
  func.func @transform_2(%arg0: i32) -> (i32, i32) {
    %c0_i32 = arith.constant 0 : i32
    %c0_i32_0 = arith.constant 0 : i32
    %c0_i32_1 = arith.constant 0 : i32
    return %c0_i32, %c0_i32_0 : i32, i32
  }
  func.func @transform_3(%arg0: i32) -> (i32, i32) {
    %c0_i32 = arith.constant 0 : i32
    %c0_i32_0 = arith.constant 0 : i32
    %c0_i32_1 = arith.constant 0 : i32
    return %c0_i32, %c0_i32_0 : i32, i32
  }
  func.func @transform_4(%arg0: i32) -> (i32, i32) {
    %c0_i32 = arith.constant 0 : i32
    %c0_i32_0 = arith.constant 0 : i32
    %c0_i32_1 = arith.constant 0 : i32
    return %c0_i32, %c0_i32_0 : i32, i32
  }
  func.func @transform_5(%arg0: i32) -> (i32, i32) {
    %c0_i32 = arith.constant 0 : i32
    %c0_i32_0 = arith.constant 0 : i32
    %c0_i32_1 = arith.constant 0 : i32
    return %c0_i32, %c0_i32_0 : i32, i32
  }
  func.func @transform_6(%arg0: i32) -> (i32, i32) {
    %c0_i32 = arith.constant 0 : i32
    %c0_i32_0 = arith.constant 0 : i32
    %c0_i32_1 = arith.constant 0 : i32
    return %c0_i32, %c0_i32_0 : i32, i32
  }
  func.func @transform_7(%arg0: i32) -> (i32, i32) {
    %c0_i32 = arith.constant 0 : i32
    %c0_i32_0 = arith.constant 0 : i32
    %c0_i32_1 = arith.constant 0 : i32
    return %c0_i32, %c0_i32_0 : i32, i32
  }
  func.func @transform_8(%arg0: i32) -> (i32, i32) {
    %c0_i32 = arith.constant 0 : i32
    %c0_i32_0 = arith.constant 0 : i32
    %c0_i32_1 = arith.constant 0 : i32
    return %c0_i32, %c0_i32_0 : i32, i32
  }
  func.func @transform_9(%arg0: i32) -> (i32, i32) {
    %c0_i32 = arith.constant 0 : i32
    %c0_i32_0 = arith.constant 0 : i32
    %c0_i32_1 = arith.constant 0 : i32
    return %c0_i32, %c0_i32_0 : i32, i32
  }
  func.func @transform_10(%arg0: i32) -> (i32, i32) {
    %c0_i32 = arith.constant 0 : i32
    %c0_i32_0 = arith.constant 0 : i32
    %c0_i32_1 = arith.constant 0 : i32
    return %c0_i32, %c0_i32_0 : i32, i32
  }
  func.func @transform_11(%arg0: i32) -> (i32, i32) {
    %c0_i32 = arith.constant 0 : i32
    %c0_i32_0 = arith.constant 0 : i32
    return %arg0, %c0_i32 : i32, i32
  }
}

</mosaic_0001>

<bundles_post_ra>
// kernel: tpu_custom_call.1
= control target key start
LH: loop header
LB: loop body
LE: loop exit
PB: predicated region body
PF: predicated region fallthrough
CT: control target
= control target key end

     0   :  { %16 = vsyncpa [#allocation3], 0  ;;  %s1578_s0 = inlined_call_operand.hbm [shape: bf16[8,512], index: 0, kind: input, shape index: {}]   ;;  %s1579_s1 = inlined_call_operand.hbm [shape: bf16[512,256], index: 1, kind: input, shape index: {}]   ;;  %s1580_s2 = inlined_call_operand.vmem [shape: f32[1,256], index: 2, kind: input, shape index: {}]   ;;  %s1581_s3 = inlined_call_operand.vmem [shape: f32[1,256], index: 3, kind: input, shape index: {}]   ;;  %s1582_s4 = inlined_call_operand.vmem [shape: f32[1,256], index: 4, kind: input, shape index: {}]   ;;  %s1583_s5 = inlined_call_operand.hbm [shape: bf16[256,128], index: 5, kind: input, shape index: {}]   ;;  %s1584_s6 = inlined_call_operand.vmem [shape: f32[1,128], index: 6, kind: input, shape index: {}]   ;;  %s1585_s7 = inlined_call_operand.vmem [shape: f32[1,128], index: 7, kind: input, shape index: {}]   ;;  %s1586_s8 = inlined_call_operand.vmem [shape: f32[1,128], index: 8, kind: input, shape index: {}]   ;;  %s1587_s9 = inlined_call_operand.hbm [shape: bf16[128,128], index: 9, kind: input, shape index: {}]   ;;  %s1588_s10 = inlined_call_operand.vmem [shape: f32[1,128], index: 10, kind: input, shape index: {}]   ;;  %s1589_s11 = inlined_call_operand.hbm [shape: f32[8,128], index: 11, kind: output, shape index: {}]  }
   0x1   :  { %17 = vsyncpa [#allocation6], 0 }
   0x2   :  { %18 = vsyncpa [#allocation9], 0 }
   0x3   :  { %19 = vsyncpa [#allocation4], 0  ;;  %s1410_s17 = smov [#allocation5]   ;;  %s1292_s21 = scalar_lea.hbm %s1579_s1, 8192 }
   0x4   :  { %s35_s18 = sshll.u32 %s1410_s17, 4  ;;  %p1293_p0 = scmp.ne.s32.totalorder %s1579_s1, %s1292_s21  ;;  %s36_s18 = int_to_ptr.vmem [resolvable:$true] %s35_s18 }
   0x5   :  { %p1296_p1 = scmp.lt.u32.totalorder %s1292_s21, %s1579_s1 }
   0x7   :  { %p1298_p2 = pnand %p1296_p1, %p1293_p0 }
   0x9   :  { %1301 = shalt.err (!%p1298_p2)
}
   0xa   :  { %s1302_s26 = scalar_lea.vmem %s36_s18, 8192  ;;  %p1307_p4 = scmp.lt.s32.totalorder %s36_s18, %s36_s18 }
   0xb   :  { %p1303_p3 = scmp.ne.s32.totalorder %s36_s18, %s1302_s26  ;;  %p1308_p5 = scmp.lt.s32.totalorder %s1302_s26, %s1302_s26 }
   0xd   :  { %p1309_p6 = por %p1308_p5, %p1307_p4 }
   0xf   :  { %p1310_p7 = pnand %p1309_p6, %p1303_p3 }
  0x11   :  { %1313 = shalt.err (!%p1310_p7)
}
  0x12   :  { %s1411_s27 = smov 128   ;;  %s1412_s28 = smov 8  }
  0x13   :  { %41 = dma.hbm_to_vmem [thread:$0]  %s1579_s1, 8192, %s36_s18, [#allocation6], %s1411_s27, %s1411_s27, %s1412_s28  }
  0x14   :  { %s1413_s12 = smov [#allocation2]   ;;  %s1414_s14 = smov [#allocation7]  }
  0x15   :  { %s26_s13 = sshll.u32 %s1413_s12, 4  ;;  %s53_s15 = sshll.u32 %s1414_s14, 4  ;;  %s27_s13 = int_to_ptr.vmem [resolvable:$true] %s26_s13  ;;  %s54_s15 = int_to_ptr.vmem [resolvable:$true] %s53_s15 }
  0x16   :  { %s1314_s19 = scalar_lea.hbm %s1578_s0, 256 }
  0x17   :  { %p1315_p8 = scmp.ne.s32.totalorder %s1578_s0, %s1314_s19  ;;  %p1318_p9 = scmp.lt.u32.totalorder %s1314_s19, %s1578_s0 }
  0x19   :  { %p1320_p10 = pnand %p1318_p9, %p1315_p8 }
  0x1b   :  { %1323 = shalt.err (!%p1320_p10)
}
  0x1c   :  { %s1324_s1 = scalar_lea.vmem %s27_s13, 256  ;;  %p1329_p12 = scmp.lt.s32.totalorder %s27_s13, %s27_s13 }
  0x1d   :  { %p1325_p11 = scmp.ne.s32.totalorder %s27_s13, %s1324_s1  ;;  %p1330_p13 = scmp.lt.s32.totalorder %s1324_s1, %s1324_s1 }
  0x1f   :  { %p1331_p0 = por %p1330_p13, %p1329_p12 }
  0x21   :  { %p1332_p1 = pnand %p1331_p0, %p1325_p11 }
  0x23   :  { %1335 = shalt.err (!%p1332_p1)
}
  0x24   :  { %29 = dma.hbm_to_vmem [thread:$0]  %s1578_s0, 256, %s27_s13, [#allocation3]  }
  0x25   :  { %s1336_s27 = scalar_lea.hbm %s1583_s5, 2048 }
  0x26   :  { %p1337_p2 = scmp.ne.s32.totalorder %s1583_s5, %s1336_s27  ;;  %p1340_p3 = scmp.lt.u32.totalorder %s1336_s27, %s1583_s5 }
  0x28   :  { %p1342_p4 = pnand %p1340_p3, %p1337_p2 }
  0x2a   :  { %1345 = shalt.err (!%p1342_p4)
}
  0x2b   :  { %s1346_s14 = scalar_lea.vmem %s54_s15, 2048  ;;  %p1351_p6 = scmp.lt.s32.totalorder %s54_s15, %s54_s15 }
  0x2c   :  { %p1347_p5 = scmp.ne.s32.totalorder %s54_s15, %s1346_s14  ;;  %p1352_p7 = scmp.lt.s32.totalorder %s1346_s14, %s1346_s14 }
  0x2e   :  { %p1353_p8 = por %p1352_p7, %p1351_p6 }
  0x30   :  { %p1354_p9 = pnand %p1353_p8, %p1347_p5 }
  0x32   :  { %1357 = shalt.err (!%p1354_p9)
}
  0x33   :  { %s1415_s0 = smov 64   ;;  %s1416_s13 = smov 4  }
  0x34   :  { %59 = dma.hbm_to_vmem [thread:$0]  %s1583_s5, 2048, %s54_s15, [#allocation6], %s1415_s0, %s1415_s0, %s1416_s13  }
  0x35   :  { %s1417_s19 = smov [#allocation8]   ;;  %s1358_s23 = scalar_lea.hbm %s1587_s9, 1024 }
  0x36   :  { %s71_s20 = sshll.u32 %s1417_s19, 4  ;;  %p1359_p10 = scmp.ne.s32.totalorder %s1587_s9, %s1358_s23  ;;  %s72_s20 = int_to_ptr.vmem [resolvable:$true] %s71_s20 }
  0x37   :  { %p1362_p11 = scmp.lt.u32.totalorder %s1358_s23, %s1587_s9 }
  0x39   :  { %p1364_p12 = pnand %p1362_p11, %p1359_p10 }
  0x3b   :  { %1367 = shalt.err (!%p1364_p12)
}
  0x3c   :  { %s1368_s26 = scalar_lea.vmem %s72_s20, 1024  ;;  %p1373_p0 = scmp.lt.s32.totalorder %s72_s20, %s72_s20 }
  0x3d   :  { %p1369_p13 = scmp.ne.s32.totalorder %s72_s20, %s1368_s26  ;;  %p1374_p1 = scmp.lt.s32.totalorder %s1368_s26, %s1368_s26 }
  0x3f   :  { %p1375_p2 = por %p1374_p1, %p1373_p0 }
  0x41   :  { %p1376_p3 = pnand %p1375_p2, %p1369_p13 }
  0x43   :  { %1379 = shalt.err (!%p1376_p3)
}
  0x44   :  { %77 = dma.hbm_to_vmem [thread:$0]  %s1587_s9, 1024, %s72_s20, [#allocation9], %s1415_s0, %s1415_s0, %s1416_s13  }
  0x45   :  { %1402 = dma.done.wait [#allocation3], 256  }
  0x46   :  { %1403 = vsyncadd [#allocation3], 4294967040 }
  0x47   :  { %1404 = dma.done.wait [#allocation6], 10240  }
  0x48   :  { %1405 = vsyncadd [#allocation6], 4294957056 }
  0x49   :  { %1406 = dma.done.wait [#allocation9], 1024  }
  0x4a   :  { %1407 = vsyncadd [#allocation9], 4294966272  ;;  %v1158_v0 = vld [vmem:[#allocation5 + $0x4] ss:$8 sps:$4 sm:$0xff]   ;;  %v1160_v1 = vld [vmem:[#allocation5] ss:$8 sps:$4 sm:$0xff]  }
  0x4b   :  { %505 = vmatprep.subr.bf16.mxu0 %v1158_v0  ;;  %v1161_v2 = vld [vmem:[#allocation5 + $0x14] ss:$8 sps:$4 sm:$0xff]   ;;  %v1163_v3 = vld [vmem:[#allocation5 + $0x10] ss:$8 sps:$4 sm:$0xff]   ;;  %v1164_v4 = vld [vmem:[#allocation5 + $0x24] ss:$8 sps:$4 sm:$0xff]  }
  0x4c   :  { %506 = vmatpush1.bf16.msra.mxu0 %v1160_v1  ;;  %v1166_v5 = vld [vmem:[#allocation5 + $0x20] ss:$8 sps:$4 sm:$0xff]   ;;  %v1167_v6 = vld [vmem:[#allocation5 + $0x34] ss:$8 sps:$4 sm:$0xff]   ;;  %v1169_v7 = vld [vmem:[#allocation5 + $0x30] ss:$8 sps:$4 sm:$0xff]  }
  0x4d   :  { %507 = vmatprep.subr.bf16.mxu0 %v1161_v2  ;;  %v1170_v8 = vld [vmem:[#allocation5 + $0x44] ss:$8 sps:$4 sm:$0xff]   ;;  %v1172_v9 = vld [vmem:[#allocation5 + $0x40] ss:$8 sps:$4 sm:$0xff]   ;;  %v1173_v10 = vld [vmem:[#allocation5 + $0x54] ss:$8 sps:$4 sm:$0xff]  }
  0x4e   :  { %v1175_v11 = vld [vmem:[#allocation5 + $0x50] ss:$8 sps:$4 sm:$0xff]   ;;  %v1176_v12 = vld [vmem:[#allocation5 + $0x64] ss:$8 sps:$4 sm:$0xff]   ;;  %v1178_v15 = vld [vmem:[#allocation5 + $0x60] ss:$8 sps:$4 sm:$0xff]  }
  0x4f   :  { %v93_v13 = vld [vmem:[#allocation2] sm:$0xff]  ;;  %v1182_v18 = vld [vmem:[#allocation5 + $0x84] ss:$8 sps:$4 sm:$0xff]   ;;  %v1184_v19 = vld [vmem:[#allocation5 + $0x80] ss:$8 sps:$4 sm:$0xff]   ;;  %vm1419_vm0 = vmmov 0  }
  0x50   :  { %508 = vmatpush1.bf16.msra.mxu0 %v1163_v3  ;;  %v995_v14 = vcombine.high %v93_v13, %v93_v13  ;;  %v1179_v16 = vld [vmem:[#allocation5 + $0x74] ss:$8 sps:$4 sm:$0xff]   ;;  %v1181_v17 = vld [vmem:[#allocation5 + $0x70] ss:$8 sps:$4 sm:$0xff]   ;;  %v1188_v22 = vld [vmem:[#allocation5 + $0xa4] ss:$8 sps:$4 sm:$0xff]   ;;  %v994_v36 = vcombine.low %v93_v13, %v93_v13 }
  0x51   :  { %509 = vmatprep.subr.bf16.mxu0 %v1164_v4  ;;  %v1185_v20 = vld [vmem:[#allocation5 + $0x94] ss:$8 sps:$4 sm:$0xff]   ;;  %v1187_v21 = vld [vmem:[#allocation5 + $0x90] ss:$8 sps:$4 sm:$0xff]   ;;  %v1190_v23 = vld [vmem:[#allocation5 + $0xa0] ss:$8 sps:$4 sm:$0xff]  }
  0x52   :  { %537 = vmatprep.mubr.bf16.mxu0 %v995_v14  ;;  %v1191_v24 = vld [vmem:[#allocation5 + $0xb4] ss:$8 sps:$4 sm:$0xff]   ;;  %v1193_v25 = vld [vmem:[#allocation5 + $0xb0] ss:$8 sps:$4 sm:$0xff]   ;;  %v1194_v26 = vld [vmem:[#allocation5 + $0xc4] ss:$8 sps:$4 sm:$0xff]  }
  0x53   :  { %v1196_v27 = vld [vmem:[#allocation5 + $0xc0] ss:$8 sps:$4 sm:$0xff]   ;;  %v1197_v28 = vld [vmem:[#allocation5 + $0xd4] ss:$8 sps:$4 sm:$0xff]   ;;  %v1199_v29 = vld [vmem:[#allocation5 + $0xd0] ss:$8 sps:$4 sm:$0xff]  }
  0x54   :  { %510 = vmatpush1.bf16.msra.mxu0 %v1166_v5  ;;  %v1200_v30 = vld [vmem:[#allocation5 + $0xe4] ss:$8 sps:$4 sm:$0xff]   ;;  %v1202_v31 = vld [vmem:[#allocation5 + $0xe0] ss:$8 sps:$4 sm:$0xff]   ;;  %v1203_v32 = vld [vmem:[#allocation5 + $0xf4] ss:$8 sps:$4 sm:$0xff]  }
  0x55   :  { %511 = vmatprep.subr.bf16.mxu0 %v1167_v6  ;;  %v1205_v33 = vld [vmem:[#allocation5 + $0xf0] ss:$8 sps:$4 sm:$0xff]   ;;  %v1210_v34 = vld [vmem:[#allocation5 + $0x104] ss:$8 sps:$4 sm:$0xff]   ;;  %v1208_v37 = vld [vmem:[#allocation5 + $0x100] ss:$8 sps:$4 sm:$0xff]   ;;  %v161_v6 = vlaneseq }
  0x56   :  { %v1529_v35 = vld [vmem:[#allocation2 + $0x8] sm:$0xff]  ;;  %v1216_v41 = vld [vmem:[#allocation5 + $0x124] ss:$8 sps:$4 sm:$0xff]   ;;  %v1214_v42 = vld [vmem:[#allocation5 + $0x120] ss:$8 sps:$4 sm:$0xff]   ;;  %s1420_s16 = smov [#allocation10]  }
  0x57   :  { %v997_v38 = vcombine.high %v1529_v35, %v1529_v35  ;;  %v1213_v39 = vld [vmem:[#allocation5 + $0x114] ss:$8 sps:$4 sm:$0xff]   ;;  %v1211_v40 = vld [vmem:[#allocation5 + $0x110] ss:$8 sps:$4 sm:$0xff]   ;;  %v1222_v45 = vld [vmem:[#allocation5 + $0x144] ss:$8 sps:$4 sm:$0xff]   ;;  %v996_v5 = vcombine.low %v1529_v35, %v1529_v35 }
  0x58   :  { %512 = vmatpush1.bf16.msra.mxu0 %v1169_v7  ;;  %v1219_v43 = vld [vmem:[#allocation5 + $0x134] ss:$8 sps:$4 sm:$0xff]   ;;  %v1217_v44 = vld [vmem:[#allocation5 + $0x130] ss:$8 sps:$4 sm:$0xff]   ;;  %v1220_v46 = vld [vmem:[#allocation5 + $0x140] ss:$8 sps:$4 sm:$0xff]  }
  0x59   :  { %513 = vmatprep.subr.bf16.mxu0 %v1170_v8  ;;  %v1225_v47 = vld [vmem:[#allocation5 + $0x154] ss:$8 sps:$4 sm:$0xff]   ;;  %v1223_v48 = vld [vmem:[#allocation5 + $0x150] ss:$8 sps:$4 sm:$0xff]   ;;  %v1228_v49 = vld [vmem:[#allocation5 + $0x164] ss:$8 sps:$4 sm:$0xff]  }
  0x5a   :  { %v1226_v50 = vld [vmem:[#allocation5 + $0x160] ss:$8 sps:$4 sm:$0xff]   ;;  %v1231_v51 = vld [vmem:[#allocation5 + $0x174] ss:$8 sps:$4 sm:$0xff]   ;;  %v1229_v52 = vld [vmem:[#allocation5 + $0x170] ss:$8 sps:$4 sm:$0xff]  }
  0x5b   :  { %v1234_v53 = vld [vmem:[#allocation5 + $0x184] ss:$8 sps:$4 sm:$0xff]   ;;  %v1232_v54 = vld [vmem:[#allocation5 + $0x180] ss:$8 sps:$4 sm:$0xff]   ;;  %v1237_v55 = vld [vmem:[#allocation5 + $0x194] ss:$8 sps:$4 sm:$0xff]  }
  0x5c   :  { %514 = vmatpush1.bf16.msra.mxu0 %v1172_v9  ;;  %v1235_v56 = vld [vmem:[#allocation5 + $0x190] ss:$8 sps:$4 sm:$0xff]   ;;  %v1240_v57 = vld [vmem:[#allocation5 + $0x1a4] ss:$8 sps:$4 sm:$0xff]   ;;  %v1238_v58 = vld [vmem:[#allocation5 + $0x1a0] ss:$8 sps:$4 sm:$0xff]  }
  0x5d   :  { %515 = vmatprep.subr.bf16.mxu0 %v1173_v10  ;;  %v1243_v59 = vld [vmem:[#allocation5 + $0x1b4] ss:$8 sps:$4 sm:$0xff]   ;;  %v1241_v60 = vld [vmem:[#allocation5 + $0x1b0] ss:$8 sps:$4 sm:$0xff]   ;;  %v1246_v61 = vld [vmem:[#allocation5 + $0x1c4] ss:$8 sps:$4 sm:$0xff]  }
  0x5e   :  { %v1244_v62 = vld [vmem:[#allocation5 + $0x1c0] ss:$8 sps:$4 sm:$0xff]   ;;  %v1249_v63 = vld [vmem:[#allocation5 + $0x1d4] ss:$8 sps:$4 sm:$0xff]   ;;  %v1247_v0 = vld [vmem:[#allocation5 + $0x1d0] ss:$8 sps:$4 sm:$0xff]  }
  0x5f   :  { %v1252_v1 = vld [vmem:[#allocation5 + $0x1e4] ss:$8 sps:$4 sm:$0xff]   ;;  %v1250_v2 = vld [vmem:[#allocation5 + $0x1e0] ss:$8 sps:$4 sm:$0xff]   ;;  %v1255_v3 = vld [vmem:[#allocation5 + $0x1f4] ss:$8 sps:$4 sm:$0xff]  }
  0x60   :  { %516 = vmatpush1.bf16.msra.mxu0 %v1175_v11  ;;  %v1253_v4 = vld [vmem:[#allocation5 + $0x1f0] ss:$8 sps:$4 sm:$0xff]   ;;  %v162_v7 = vshrl.u32 %v161_v6, 7  ;;  %v1266_v35 = vld [vmem:[#allocation7 + $0x60] sm:$0xff]  }
  0x61   :  { %517 = vmatprep.subr.bf16.mxu0 %v1176_v12  ;;  %v159_v9 = vld [vmem:[%s1580_s2] sm:$0x3] }
  0x62   :  { %v1535_v8 = vsub.s32 0, %v162_v7  ;;  %v1540_v10 = vsub.s32 1, %v162_v7 }
  0x64   :  { %518 = vmatpush1.bf16.msra.mxu0 %v1178_v15  ;;  %v164_v11 = vrot.slane %v159_v9, %v1535_v8  ;;  %v168_v12 = vrot.slane %v159_v9, %v1540_v10 }
  0x65   :  { %519 = vmatprep.subr.bf16.mxu0 %v1179_v16 }
  0x68   :  { %520 = vmatpush1.bf16.msra.mxu0 %v1181_v17 }
  0x69   :  { %521 = vmatprep.subr.bf16.mxu0 %v1182_v18 }
  0x6c   :  { %522 = vmatpush1.bf16.msra.mxu0 %v1184_v19 }
  0x6d   :  { %523 = vmatprep.subr.bf16.mxu0 %v1185_v20 }
  0x70   :  { %524 = vmatpush1.bf16.msra.mxu0 %v1187_v21 }
  0x71   :  { %525 = vmatprep.subr.bf16.mxu0 %v1188_v22 }
  0x74   :  { %526 = vmatpush1.bf16.msra.mxu0 %v1190_v23 }
  0x75   :  { %527 = vmatprep.subr.bf16.mxu0 %v1191_v24 }
  0x78   :  { %528 = vmatpush1.bf16.msra.mxu0 %v1193_v25 }
  0x79   :  { %529 = vmatprep.subr.bf16.mxu0 %v1194_v26 }
  0x7c   :  { %530 = vmatpush1.bf16.msra.mxu0 %v1196_v27  ;;  %v1258_v27 = vld [vmem:[#allocation7 + $0x40] sm:$0xff]  }
  0x7d   :  { %531 = vmatprep.subr.bf16.mxu0 %v1197_v28  ;;  %v1259_v28 = vld [vmem:[#allocation7] sm:$0xff]   ;;  %1090 = vmatprep.subr.bf16.mxu1 %v1258_v27  ;;  %v1418_v27 = vmov 0.0  }
  0x7e   :  { %1091 = vmatpush3.bf16.msra.mxu1 %v1259_v28  ;;  %v1275_v28 = vld [vmem:[#allocation8 + $0x8] sm:$0xff]  }
  0x80   :  { %532 = vmatpush1.bf16.msra.mxu0 %v1199_v29  ;;  %v1260_v29 = vld [vmem:[#allocation7 + $0x48] sm:$0xff]  }
  0x81   :  { %533 = vmatprep.subr.bf16.mxu0 %v1200_v30  ;;  %v1261_v30 = vld [vmem:[#allocation7 + $0x8] sm:$0xff]   ;;  %1092 = vmatprep.subr.bf16.mxu1 %v1260_v29  ;;  %v1276_v29 = vld [vmem:[#allocation8 + $0x10] sm:$0xff]  }
  0x82   :  { %1093 = vmatpush3.bf16.msra.mxu1 %v1261_v30  ;;  %v1277_v30 = vld [vmem:[#allocation8 + $0x18] sm:$0xff]  }
  0x84   :  { %534 = vmatpush1.bf16.msra.mxu0 %v1202_v31  ;;  %v1262_v31 = vld [vmem:[#allocation7 + $0x50] sm:$0xff]  }
  0x85   :  { %535 = vmatprep.subr.bf16.mxu0 %v1203_v32  ;;  %v1263_v32 = vld [vmem:[#allocation7 + $0x10] sm:$0xff]   ;;  %1094 = vmatprep.subr.bf16.mxu1 %v1262_v31  ;;  %v1278_v31 = vld [vmem:[#allocation8 + $0x20] sm:$0xff]  }
  0x86   :  { %1095 = vmatpush3.bf16.msra.mxu1 %v1263_v32  ;;  %v1279_v32 = vld [vmem:[#allocation8 + $0x28] sm:$0xff]  }
  0x88   :  { %536 = vmatpush1.bf16.msra.mxu0 %v1205_v33  ;;  %v1264_v33 = vld [vmem:[#allocation7 + $0x58] sm:$0xff]  }
  0x89   :  { %546 = vmatprep.subr.bf16.mxu0 %v1210_v34  ;;  %v1265_v34 = vld [vmem:[#allocation7 + $0x18] sm:$0xff]   ;;  %1096 = vmatprep.subr.bf16.mxu1 %v1264_v33  ;;  %v1280_v33 = vld [vmem:[#allocation8 + $0x30] sm:$0xff]  }
  0x8a   :  { %1097 = vmatpush3.bf16.msra.mxu1 %v1265_v34  ;;  %v1281_v34 = vld [vmem:[#allocation8 + $0x38] sm:$0xff]  }
  0x8b   :  { %538 = vmatmul.mubr.bf16.vlgmr.msra.gmra.mrb[0].mxu0 %v994_v36  ;;  %v1267_v36 = vld [vmem:[#allocation7 + $0x20] sm:$0xff]   ;;  %1098 = vmatprep.subr.bf16.mxu1 %v1266_v35 }
  0x8c   :  { %547 = vmatpush1.bf16.msra.mxu0 %v1208_v37  ;;  %578 = vmatprep.mubr.bf16.mxu0 %v997_v38  ;;  %v1268_v37 = vld [vmem:[#allocation7 + $0x68] sm:$0xff]  }
  0x8d   :  { %548 = vmatprep.subr.bf16.mxu0 %v1213_v39  ;;  %v1269_v38 = vld [vmem:[#allocation7 + $0x28] sm:$0xff]   ;;  %v1270_v39 = vld [vmem:[#allocation7 + $0x70] sm:$0xff]  }
  0x8e   :  { %1099 = vmatpush3.bf16.msra.mxu1 %v1267_v36 }
  0x8f   :  { %1100 = vmatprep.subr.bf16.mxu1 %v1268_v37 }
  0x90   :  { %549 = vmatpush1.bf16.msra.mxu0 %v1211_v40  ;;  %v1271_v40 = vld [vmem:[#allocation7 + $0x30] sm:$0xff]  }
  0x91   :  { %550 = vmatprep.subr.bf16.mxu0 %v1216_v41  ;;  %v1272_v41 = vld [vmem:[#allocation7 + $0x78] sm:$0xff]  }
  0x92   :  { %1101 = vmatpush3.bf16.msra.mxu1 %v1269_v38 }
  0x93   :  { %1102 = vmatprep.subr.bf16.mxu1 %v1270_v39  ;;  %v1079_v39 = vld [vmem:[%s1585_s7] ss:$0 sm:$0xff] }
  0x94   :  { %551 = vmatpush1.bf16.msra.mxu0 %v1214_v42  ;;  %v1273_v42 = vld [vmem:[#allocation7 + $0x38] sm:$0xff]  }
  0x95   :  { %552 = vmatprep.subr.bf16.mxu0 %v1219_v43 }
  0x96   :  { %1103 = vmatpush3.bf16.msra.mxu1 %v1271_v40 }
  0x97   :  { %1104 = vmatprep.subr.bf16.mxu1 %v1272_v41  ;;  %v1080_v41 = vld [vmem:[%s1586_s8] ss:$0 sm:$0xff]  ;;  %s983_s8 = sshll.u32 %s1420_s16, 4  ;;  %s984_s8 = int_to_ptr.vmem [resolvable:$true] %s983_s8 }
  0x98   :  { %553 = vmatpush1.bf16.msra.mxu0 %v1217_v44  ;;  %s1380_s17 = scalar_lea.vmem %s984_s8, 128  ;;  %p1385_p5 = scmp.lt.s32.totalorder %s984_s8, %s984_s8 }
  0x99   :  { %554 = vmatprep.subr.bf16.mxu0 %v1222_v45  ;;  %p1381_p4 = scmp.ne.s32.totalorder %s984_s8, %s1380_s17  ;;  %p1386_p6 = scmp.lt.s32.totalorder %s1380_s17, %s1380_s17 }
  0x9a   :  { %1105 = vmatpush3.bf16.msra.mxu1 %v1273_v42 }
  0x9b   :  { %1121 = vmatprep.subr.bf16.mxu1 %v1418_v27  ;;  %p1387_p7 = por %p1386_p6, %p1385_p5 }
  0x9c   :  { %555 = vmatpush1.bf16.msra.mxu0 %v1220_v46  ;;  %v587_v46 = vld [vmem:[%s1581_s3] sm:$0x3] }
  0x9d   :  { %556 = vmatprep.subr.bf16.mxu0 %v1225_v47  ;;  %v588_v47 = vld [vmem:[%s1582_s4] sm:$0x3]  ;;  %p1388_p8 = pnand %p1387_p7, %p1381_p4 }
  0xa0   :  { %557 = vmatpush1.bf16.msra.mxu0 %v1223_v48  ;;  %v610_v48 = vrot.slane %v587_v46, %v1535_v8 }
  0xa1   :  { %558 = vmatprep.subr.bf16.mxu0 %v1228_v49  ;;  %v614_v49 = vrot.slane %v587_v46, %v1540_v10 }
  0xa4   :  { %559 = vmatpush1.bf16.msra.mxu0 %v1226_v50 }
  0xa5   :  { %560 = vmatprep.subr.bf16.mxu0 %v1231_v51  ;;  %v623_v51 = vrot.slane %v588_v47, %v1535_v8 }
  0xa8   :  { %561 = vmatpush1.bf16.msra.mxu0 %v1229_v52  ;;  %v627_v52 = vrot.slane %v588_v47, %v1540_v10 }
  0xa9   :  { %562 = vmatprep.subr.bf16.mxu0 %v1234_v53 }
  0xac   :  { %563 = vmatpush1.bf16.msra.mxu0 %v1232_v54 }
  0xad   :  { %564 = vmatprep.subr.bf16.mxu0 %v1237_v55 }
  0xb0   :  { %565 = vmatpush1.bf16.msra.mxu0 %v1235_v56 }
  0xb1   :  { %566 = vmatprep.subr.bf16.mxu0 %v1240_v57 }
  0xb4   :  { %567 = vmatpush1.bf16.msra.mxu0 %v1238_v58 }
  0xb5   :  { %568 = vmatprep.subr.bf16.mxu0 %v1243_v59 }
  0xb8   :  { %569 = vmatpush1.bf16.msra.mxu0 %v1241_v60 }
  0xb9   :  { %570 = vmatprep.subr.bf16.mxu0 %v1246_v61 }
  0xbc   :  { %571 = vmatpush1.bf16.msra.mxu0 %v1244_v62 }
  0xbd   :  { %572 = vmatprep.subr.bf16.mxu0 %v1249_v63 }
  0xc0   :  { %573 = vmatpush1.bf16.msra.mxu0 %v1247_v0 }
  0xc1   :  { %574 = vmatprep.subr.bf16.mxu0 %v1252_v1 }
  0xc4   :  { %575 = vmatpush1.bf16.msra.mxu0 %v1250_v2 }
  0xc5   :  { %576 = vmatprep.subr.bf16.mxu0 %v1255_v3 }
  0xc8   :  { %577 = vmatpush1.bf16.msra.mxu0 %v1253_v4 }
  0xcb   :  { %579 = vmatmul.mubr.bf16.vlgmr.msra.gmra.mrb[0].mxu0 %v996_v5 }
 0x19e   :  { %v580_v13 = vpop.f32.mrb[0].mxu0 }
 0x19f   :  { %v1141_v14 = vadd.f32 %v580_v13, %v164_v11  ;;  %v582_v15 = vpop.f32.mrb[1].mxu0 }
 0x1a0   :  { %v1142_v16 = vadd.f32 %v582_v15, %v168_v12  ;;  %v584_v17 = vpop.f32.mrb[2].mxu0 }
 0x1a1   :  { %v585_v18 = vpop.f32.mrb[3].mxu0  ;;  %v1062_v17 = vld [vmem:[%s1584_s6] ss:$0 sm:$0xff] }
 0x1a2   :  { %v589_v19 = vadd.f32 %v1142_v16, %v1141_v14 }
 0x1a4   :  { %590 = vadd.xlane.f32.xlu0 %v589_v19 }
 0x231   :  { %v591_v20 = vpop.xlane.xlu0 %590 }
 0x232   :  { %v593_v21 = vmul.f32 0.00390625, %v591_v20 }
 0x234   :  { %v594_v22 = vsub.f32 %v1141_v14, %v593_v21  ;;  %v595_v23 = vsub.f32 %v1142_v16, %v593_v21 }
 0x236   :  { %v596_v24 = vmul.f32 %v594_v22, %v594_v22  ;;  %v597_v25 = vmul.f32 %v595_v23, %v595_v23 }
 0x238   :  { %v598_v26 = vadd.f32 %v597_v25, %v596_v24 }
 0x23a   :  { %599 = vadd.xlane.f32.xlu0 %v598_v26  ;;  %v1274_v26 = vld [vmem:[#allocation8] sm:$0xff]  }
 0x2c7   :  { %v600_v43 = vpop.xlane.xlu0 %599 }
 0x2c8   :  { %v601_v44 = vmul.f32 0.00390625, %v600_v43 }
 0x2ca   :  { %v602_v45 = vadd.f32 1e-05, %v601_v44 }
 0x2cc   :  { %1282 = vrsqrt.f32 %v602_v45 }
 0x2d6   :  { %v1283_v50 = vpop.eup %1282 }
 0x2d7   :  { %v604_v53 = vmul.f32 %v1283_v50, %v594_v22  ;;  %v605_v54 = vmul.f32 %v1283_v50, %v595_v23 }
 0x2d9   :  { %v617_v55 = vmul.f32 %v610_v48, %v604_v53  ;;  %v618_v56 = vmul.f32 %v614_v49, %v605_v54  ;;  %v1081_v54 = vld [vmem:[%s1588_s10] ss:$0 sm:$0xff] }
 0x2db   :  { %v630_v57 = vadd.f32 %v623_v51, %v617_v55  ;;  %v631_v58 = vadd.f32 %v627_v52, %v618_v56 }
 0x2dd   :  { %v635_v59 = vmul.f32 0.044715, %v631_v58  ;;  %v634_v60 = vmul.f32 0.044715, %v630_v57  ;;  %v633_v7 = vmul.f32 0.5, %v631_v58  ;;  %v632_v9 = vmul.f32 0.5, %v630_v57 }
 0x2df   :  { %v637_v61 = vmul.f32 %v635_v59, %v631_v58  ;;  %v636_v62 = vmul.f32 %v634_v60, %v630_v57 }
 0x2e1   :  { %v639_v63 = vmul.f32 %v637_v61, %v631_v58  ;;  %v638_v0 = vmul.f32 %v636_v62, %v630_v57 }
 0x2e3   :  { %v641_v1 = vadd.f32 %v639_v63, %v631_v58  ;;  %v640_v2 = vadd.f32 %v638_v0, %v630_v57 }
 0x2e5   :  { %v643_v3 = vmul.f32 0.7978846, %v641_v1  ;;  %v642_v4 = vmul.f32 0.7978846, %v640_v2 }
 0x2e7   :  { %1284 = vtanh.f32 %v643_v3 }
 0x2e8   :  { %1286 = vtanh.f32 %v642_v4 }
 0x2f1   :  { %v1285_v5 = vpop.eup %1284 }
 0x2f2   :  { %v1287_v6 = vpop.eup %1286  ;;  %v647_v8 = vadd.f32 1.0, %v1285_v5 }
 0x2f3   :  { %v646_v10 = vadd.f32 1.0, %v1287_v6 }
 0x2f4   :  { %v649_v11 = vmul.f32 %v647_v8, %v633_v7 }
 0x2f5   :  { %v648_v12 = vmul.f32 %v646_v10, %v632_v9 }
 0x2f6   :  { %v651_v13 = vpack.c.bf16 %v649_v11, %v649_v11 }
 0x2f7   :  { %v650_v14 = vpack.c.bf16 %v648_v12, %v648_v12 }
 0x2f8   :  { %819 = vmatprep.mubr.bf16.mxu1 %v651_v13 }
 0x2f9   :  { %820 = vmatmul.mubr.bf16.vlgmr.msra.gmra.mrb[0].mxu1 %v650_v14 }
 0x2fa   :  { %1122 = vmatpush3.bf16.msra.mxu1 %v1274_v26  ;;  %1137 = vmatprep.mubr.msk.bf16.mxu1 %vm1419_vm0, %v1418_v27 }
 0x2fb   :  { %1123 = vmatprep.subr.bf16.mxu1 %v1418_v27 }
 0x2fe   :  { %1124 = vmatpush3.bf16.msra.mxu1 %v1275_v28 }
 0x2ff   :  { %1125 = vmatprep.subr.bf16.mxu1 %v1418_v27 }
 0x302   :  { %1126 = vmatpush3.bf16.msra.mxu1 %v1276_v29 }
 0x303   :  { %1127 = vmatprep.subr.bf16.mxu1 %v1418_v27 }
 0x306   :  { %1128 = vmatpush3.bf16.msra.mxu1 %v1277_v30 }
 0x307   :  { %1129 = vmatprep.subr.bf16.mxu1 %v1418_v27 }
 0x30a   :  { %1130 = vmatpush3.bf16.msra.mxu1 %v1278_v31 }
 0x30b   :  { %1131 = vmatprep.subr.bf16.mxu1 %v1418_v27 }
 0x30e   :  { %1132 = vmatpush3.bf16.msra.mxu1 %v1279_v32 }
 0x30f   :  { %1133 = vmatprep.subr.bf16.mxu1 %v1418_v27 }
 0x312   :  { %1134 = vmatpush3.bf16.msra.mxu1 %v1280_v33 }
 0x313   :  { %1135 = vmatprep.subr.bf16.mxu1 %v1418_v27 }
 0x316   :  { %1136 = vmatpush3.bf16.msra.mxu1 %v1281_v34 }
 0x3cc   :  { %v1106_v15 = vpop.f32.mrb[0].mxu1 }
 0x3cd   :  { %v1107_v16 = vpop.f32.mrb[1].mxu1 }
 0x3ce   :  { %v1108_v18 = vadd.f32 %v1107_v16, %v1106_v15  ;;  %v1109_v19 = vpop.f32.mrb[2].mxu1 }
 0x3cf   :  { %v1110_v20 = vpop.f32.mrb[3].mxu1 }
 0x3d0   :  { %v822_v21 = vadd.f32 %v1108_v18, %v1062_v17 }
 0x3d2   :  { %829 = vadd.xlane.f32.xlu1 %v822_v21 }
 0x45f   :  { %v830_v22 = vpop.xlane.xlu1 %829 }
 0x460   :  { %v832_v23 = vmul.f32 0.0078125, %v830_v22 }
 0x462   :  { %v833_v24 = vsub.f32 %v822_v21, %v832_v23 }
 0x464   :  { %v834_v25 = vmul.f32 %v833_v24, %v833_v24 }
 0x466   :  { %835 = vadd.xlane.f32.xlu1 %v834_v25 }
 0x4f3   :  { %v836_v35 = vpop.xlane.xlu1 %835 }
 0x4f4   :  { %v837_v36 = vmul.f32 0.0078125, %v836_v35 }
 0x4f6   :  { %v838_v37 = vadd.f32 1e-05, %v837_v36 }
 0x4f8   :  { %1288 = vrsqrt.f32 %v838_v37 }
 0x502   :  { %v1289_v38 = vpop.eup %1288 }
 0x503   :  { %v840_v40 = vmul.f32 %v1289_v38, %v833_v24 }
 0x505   :  { %v847_v42 = vmul.f32 %v1079_v39, %v840_v40 }
 0x507   :  { %v854_v43 = vadd.f32 %v1080_v41, %v847_v42 }
 0x509   :  { %v856_v44 = vmul.f32 0.044715, %v854_v43  ;;  %v855_v50 = vmul.f32 0.5, %v854_v43 }
 0x50b   :  { %v857_v45 = vmul.f32 %v856_v44, %v854_v43 }
 0x50d   :  { %v858_v46 = vmul.f32 %v857_v45, %v854_v43 }
 0x50f   :  { %v859_v47 = vadd.f32 %v858_v46, %v854_v43 }
 0x511   :  { %v860_v48 = vmul.f32 0.7978846, %v859_v47 }
 0x513   :  { %1290 = vtanh.f32 %v860_v48 }
 0x51d   :  { %v1291_v49 = vpop.eup %1290 }
 0x51e   :  { %v862_v51 = vadd.f32 1.0, %v1291_v49 }
 0x520   :  { %v863_v52 = vmul.f32 %v862_v51, %v855_v50 }
 0x522   :  { %v864_v53 = vpack.c.bf16 %v863_v52, %v863_v52 }
 0x524   :  { %1138 = vmatmul.mubr.bf16.vlgmr.msra.gmra.mrb[4].mxu1 %v864_v53 }
 0x5f7   :  { %v970_v55 = vpop.f32.mrb[4].mxu1 }
 0x5f8   :  { %v971_v56 = vadd.f32 %v1081_v54, %v970_v55  ;;  %v1139_v57 = vpop.f32.mrb[5].mxu1 }
 0x5f9   :  { %v973_v58 = vpop.f32.mrb[6].mxu1 }
 0x5fa   :  { %976 = vst [vmem:[#allocation10] sm:$0xff] %v971_v56  ;;  %v1140_v59 = vpop.f32.mrb[7].mxu1 }
 0x5fb   :  { %1391 = shalt.err (!%p1388_p8)
}
 0x5fc   :  { %s1392_s10 = scalar_lea.hbm %s1589_s11, 128 }
 0x5fd   :  { %p1393_p9 = scmp.ne.s32.totalorder %s1589_s11, %s1392_s10  ;;  %p1396_p10 = scmp.lt.u32.totalorder %s1392_s10, %s1589_s11 }
 0x5ff   :  { %p1398_p11 = pnand %p1396_p10, %p1393_p9 }
 0x601   :  { %1401 = shalt.err (!%p1398_p11)
}
 0x602   :  { %986 = dma.vmem_to_hbm [thread:$0]  %s984_s8, 128, %s1589_s11, [#allocation4]  }
 0x603   :  { %1408 = dma.done.wait [#allocation4], 128  }
 0x604   :  { %1409 = vsyncadd [#allocation4], 4294967168 }
 0x605   :  { %990 = vsyncpa [#allocation3], 1 }
 0x606   :  { %991 = vsyncpa [#allocation6], 1 }
 0x607   :  { %992 = vsyncpa [#allocation9], 1 }
 0x608   :  { %993 = vsyncpa [#allocation4], 1 }

</bundles_post_ra>
